<compile_context>
chip_gen: v7x
topology: tpu7x:2x2x1
jax: 0.10.0
libtpu: 0.0.40
codegen_flags: <defaults>
</compile_context>

<pallas_src>
import functools

import jax
import jax.numpy as jnp
from jax.experimental import pallas as pl
from jax.experimental.pallas import tpu as pltpu


def _make_vdot_kernel(label: int):
    """Build the kernel with `label` closed over as a compile-time constant."""

    def kernel(eta_ref, f_ref, out_ref):
        eta = eta_ref[...]                                    # (TB, C)
        f = f_ref[...]                                        # (TB, C)
        C = eta.shape[1]

        # (1, C) column-index row; broadcasts over the batch rows.
        col = jax.lax.broadcasted_iota(jnp.int32, (1, C), 1)
        not_label = col != label                              # (1, C) bool

        # Row-wise max of eta and the "wrong class at the max" mask, with the
        # label column forced False.
        max_wrong = jnp.max(eta, axis=-1, keepdims=True)      # (TB, 1)
        ind_wrong = (eta == max_wrong) & not_label             # (TB, C)

        # f_y = f[:, label]: static lane slice (no one-hot reduce needed).
        f_y = f[:, label:label + 1]                           # (TB, 1)

        # f_wrong = row max of f with -inf where ~ind_wrong (scalar fill).
        f_wrong = jnp.max(jnp.where(ind_wrong, f, -jnp.inf),
                          axis=-1, keepdims=True)             # (TB, 1)

        # Reduction results already live along sublanes -> direct (TB, 1) store.
        out_ref[...] = (f_wrong - f_y).astype(out_ref.dtype)

    return kernel


def _gen_defaults():
    """Generation-aware per-input block size and scoped-VMEM limit (bytes)."""
    kind = ""
    try:
        kind = jax.devices()[0].device_kind.lower()
    except Exception:  # off-TPU tracing / unusual backends
        kind = ""
    if "v7" in kind or "7x" in kind:
        # 64 MiB physical VMEM, ~3.2 TB/s: 4 MiB blocks (2 in x 2 buf = 16 MiB).
        return 4 * 1024 * 1024, 28 * 1024 * 1024
    if "v6" in kind:
        # 128 MiB physical VMEM, ~1.4 TB/s: bigger blocks are free.
        return 6 * 1024 * 1024, 56 * 1024 * 1024
    if "v5" in kind:
        # 128 MiB physical, ~0.82 TB/s; scoped default is only 16 MiB -> raise.
        return 4 * 1024 * 1024, 40 * 1024 * 1024
    # Unknown generation: conservative.
    return 2 * 1024 * 1024, 32 * 1024 * 1024


def _pick_batch_tile(B: int, C: int, itemsize: int, block_bytes: int) -> int:
    """Largest batch tile with one input block <= block_bytes, TPU-aligned.

    The output is (TB, 1)-blocked, so TB only needs 8-alignment (or == B);
    no 128-lane constraint applies in the mid-range-TB regime.
    """
    bytes_per_row = max(1, C * itemsize)
    rows = block_bytes // bytes_per_row
    if rows >= B:
        return B                        # single block == full array dim: legal
    if rows >= 128:
        return (rows // 128) * 128      # keep large tiles 128-row aligned
    return max(8, (rows // 8) * 8)      # sublane-aligned mid/small tiles


@functools.partial(jax.jit, static_argnames=("label", "block_bytes", "vmem_limit"))
def _vdot_call(eta, f, label: int, block_bytes: int, vmem_limit: int):
    B, C = eta.shape
    itemsize = eta.dtype.itemsize
    bytes_per_row = max(1, C * itemsize)

    # Per-input block budget: requested size, but never more than what the
    # double-buffered pipeline (2 inputs x 2 buffers) can hold under the limit.
    budget = min(block_bytes, max(bytes_per_row, (vmem_limit - (2 << 20)) // 4))
    TB = _pick_batch_tile(B, C, itemsize, budget)

    # Very-large-C guard: the minimum 8-row tile may exceed the budget; raise
    # the scoped-VMEM limit so the pipeline still fits (see module TODO).
    vmem_needed = 4 * TB * bytes_per_row + (2 << 20)
    effective_vmem_limit = int(max(vmem_limit, vmem_needed))

    grid = (pl.cdiv(B, TB),)
    cost = pl.CostEstimate(
        flops=5 * B * C,
        transcendentals=0,
        bytes_accessed=2 * B * C * itemsize + B * itemsize,
    )

    out = pl.pallas_call(
        _make_vdot_kernel(label),
        out_shape=jax.ShapeDtypeStruct((B, 1), eta.dtype),
        grid_spec=pl.GridSpec(
            grid=grid,
            in_specs=[
                pl.BlockSpec((TB, C), lambda i: (i, 0)),
                pl.BlockSpec((TB, C), lambda i: (i, 0)),
            ],
            out_specs=pl.BlockSpec((TB, 1), lambda i: (i, 0)),
        ),
        compiler_params=pltpu.CompilerParams(
            # TODO(synk): verify in a trace that this single "parallel" batch
            # axis actually shards across v7x's two TensorCores; if not, use
            # pltpu.CORE_PARALLEL there so each TC drives its own DMA stream.
            dimension_semantics=("parallel",),
            vmem_limit_bytes=effective_vmem_limit,
        ),
        cost_estimate=cost,
    )(eta, f)
    return out.reshape(B)


def vdot_decision_boundary(eta, f, label, *, block_bytes=None):
    """Pallas implementation of VdotDecisionBoundary.forward.

    eta, f : (B, C) float arrays; label : python int class index.
    Returns: (B,) array.
    """
    B, C = eta.shape
    if f.shape != (B, C):
        raise ValueError(f"eta/f shape mismatch: {eta.shape} vs {f.shape}")
    if not (0 <= int(label) < C):
        raise ValueError(f"label {label} out of range for C={C}")
    default_block_bytes, default_vmem_limit = _gen_defaults()
    bb = int(block_bytes) if block_bytes is not None else default_block_bytes
    if bb <= 0:
        raise ValueError(f"block_bytes must be positive, got {bb}")
    return _vdot_call(eta, f, int(label), bb, int(default_vmem_limit))


def _reference(eta, f, label):
    # Pure-JAX reference mirroring the PyTorch forward.
    max_wrong = jnp.max(eta, axis=-1, keepdims=True)
    col = jnp.arange(eta.shape[1])[None, :]
    ind_wrong = (eta == max_wrong) & (col != label)
    f_y = f[:, label]
    f_wrong = jnp.max(jnp.where(ind_wrong, f, -jnp.inf), axis=-1)
    return -f_y + f_wrong


if __name__ == "__main__":
    key = jax.random.PRNGKey(0)
    k1, k2, k3, k4, k5, k6, k7, k8 = jax.random.split(key, 8)

    # 1) Small case consistent with the module (batch of logits over C classes).
    B, C, label = 8, 16, 3
    eta = jax.random.normal(k1, (B, C), dtype=jnp.float32)
    f = jax.random.normal(k2, (B, C), dtype=jnp.float32)
    out = jax.block_until_ready(vdot_decision_boundary(eta, f, label))
    assert out.shape == (B,)
    assert jnp.allclose(out, _reference(eta, f, label), atol=1e-5, rtol=1e-5)

    # 2) Multi-block pipelined path: TB = 128, grid of 4 batch tiles.
    B2, C2, label2 = 512, 256, 7
    eta2 = jax.random.normal(k3, (B2, C2), dtype=jnp.float32)
    f2 = jax.random.normal(k4, (B2, C2), dtype=jnp.float32)
    out2 = jax.block_until_ready(
        vdot_decision_boundary(eta2, f2, label2, block_bytes=128 * 1024))
    assert out2.shape == (B2,)
    assert jnp.allclose(out2, _reference(eta2, f2, label2), atol=1e-5, rtol=1e-5)

    # 3) Mid-range TB (64, not a multiple of 128) + non-divisible B (partial
    #    last tile). This regime hit the old output-BlockSpec alignment hole.
    B3, C3, label3 = 260, 64, 5
    eta3 = jax.random.normal(k5, (B3, C3), dtype=jnp.float32)
    f3 = jax.random.normal(k6, (B3, C3), dtype=jnp.float32)
    out3 = jax.block_until_ready(
        vdot_decision_boundary(eta3, f3, label3, block_bytes=16 * 1024))
    assert out3.shape == (B3,)
    assert jnp.allclose(out3, _reference(eta3, f3, label3), atol=1e-5, rtol=1e-5)

    # 4) Large-C / small-TB regime (TB = 16, grid of 4).
    B4, C4, label4 = 64, 4096, 4000
    eta4 = jax.random.normal(k7, (B4, C4), dtype=jnp.float32)
    f4 = jax.random.normal(k8, (B4, C4), dtype=jnp.float32)
    out4 = jax.block_until_ready(
        vdot_decision_boundary(eta4, f4, label4, block_bytes=256 * 1024))
    assert out4.shape == (B4,)
    assert jnp.allclose(out4, _reference(eta4, f4, label4), atol=1e-5, rtol=1e-5)

    print("KERNEL_OK")
</pallas_src>

<mosaic_0001>
module attributes {stable_mosaic.version = 11 : i64} {
  func.func @kernel(%arg0: i32, %arg1: memref<8x16xf32, #tpu.memory_space<vmem>>, %arg2: memref<8x16xf32, #tpu.memory_space<vmem>>, %arg3: memref<8x1xf32, #tpu.memory_space<vmem>>) attributes {dimension_semantics = [#tpu.dimension_semantics<parallel>], iteration_bounds = array<i64: 1>, scalar_prefetch = 0 : i64, scratch_operands = 0 : i64, tpu.core_type = #tpu.core_type<tc>, window_params = [{transform_indices = @transform_0, window_bounds = array<i64: 8, 16>}, {transform_indices = @transform_1, window_bounds = array<i64: 8, 16>}, {transform_indices = @transform_2, window_bounds = array<i64: 8, 1>}]} {
    %c0 = arith.constant 0 : index
    %c0_0 = arith.constant 0 : index
    %0 = vector.load %arg1[%c0, %c0_0] : memref<8x16xf32, #tpu.memory_space<vmem>>, vector<8x16xf32>
    %c0_1 = arith.constant 0 : index
    %c0_2 = arith.constant 0 : index
    %1 = vector.load %arg2[%c0_1, %c0_2] : memref<8x16xf32, #tpu.memory_space<vmem>>, vector<8x16xf32>
    %2 = tpu.iota {dimensions = array<i32: 1>} : vector<1x16xi32>
    %c3_i32 = arith.constant 3 : i32
    %3 = vector.broadcast %c3_i32 : i32 to vector<1x16xi32>
    %4 = arith.cmpi ne, %2, %3 : vector<1x16xi32>
    %cst = arith.constant dense<0xFF800000> : vector<8xf32>
    %5 = vector.multi_reduction <maximumf>, %0, %cst [1] : vector<8x16xf32> to vector<8xf32>
    %6 = vector.shape_cast %5 : vector<8xf32> to vector<8x1xf32>
    %7 = vector.broadcast %6 : vector<8x1xf32> to vector<8x16xf32>
    %8 = arith.cmpf oeq, %0, %7 : vector<8x16xf32>
    %9 = vector.broadcast %4 : vector<1x16xi1> to vector<8x16xi1>
    %10 = arith.andi %8, %9 : vector<8x16xi1>
    %11 = vector.extract_strided_slice %1 {offsets = [0, 3], sizes = [8, 1], strides = [1, 1]} : vector<8x16xf32> to vector<8x1xf32>
    %cst_3 = arith.constant 0xFF800000 : f32
    %12 = vector.broadcast %cst_3 : f32 to vector<8x16xf32>
    %13 = arith.select %10, %1, %12 : vector<8x16xi1>, vector<8x16xf32>
    %cst_4 = arith.constant dense<0xFF800000> : vector<8xf32>
    %14 = vector.multi_reduction <maximumf>, %13, %cst_4 [1] : vector<8x16xf32> to vector<8xf32>
    %15 = vector.shape_cast %14 : vector<8xf32> to vector<8x1xf32>
    %16 = arith.subf %15, %11 : vector<8x1xf32>
    %c0_5 = arith.constant 0 : index
    %c0_6 = arith.constant 0 : index
    %17 = vector.load %arg3[%c0_5, %c0_6] : memref<8x1xf32, #tpu.memory_space<vmem>>, vector<8x1xf32>
    tpu.vector_store %arg3[%c0_5, %c0_6], %16 {strides = array<i32>} : memref<8x1xf32, #tpu.memory_space<vmem>>, vector<8x1xf32>,
    return
  }
  func.func @transform_0(%arg0: i32) -> (i32, i32) {
    %c0_i32 = arith.constant 0 : i32
    %c0_i32_0 = arith.constant 0 : i32
    return %arg0, %c0_i32 : i32, i32
  }
  func.func @transform_1(%arg0: i32) -> (i32, i32) {
    %c0_i32 = arith.constant 0 : i32
    %c0_i32_0 = arith.constant 0 : i32
    return %arg0, %c0_i32 : i32, i32
  }
  func.func @transform_2(%arg0: i32) -> (i32, i32) {
    %c0_i32 = arith.constant 0 : i32
    %c0_i32_0 = arith.constant 0 : i32
    return %arg0, %c0_i32 : i32, i32
  }
}

</mosaic_0001>

<bundles_post_ra>
// kernel: _vdot_call.1
= control target key start
LH: loop header
LB: loop body
LE: loop exit
PB: predicated region body
PF: predicated region fallthrough
CT: control target
= control target key end

     0   :  { %7 = vsyncpa [#allocation3], 0  ;;  %s161_s0 = inlined_call_operand.hbm [shape: f32[8,16], index: 0, kind: input, shape index: {}]   ;;  %s162_s1 = inlined_call_operand.hbm [shape: f32[8,16], index: 1, kind: input, shape index: {}]   ;;  %s163_s2 = inlined_call_operand.vmem [shape: f32[8,1], index: 2, kind: output, shape index: {}]  }
   0x1   :  { %8 = vsyncpa [#allocation5], 0  ;;  %s116_s9 = smov [#allocation2]   ;;  %s117_s11 = smov [#allocation4]  }
   0x2   :  { %s15_s10 = sshll.u32 %s116_s9, 4  ;;  %s25_s12 = sshll.u32 %s117_s11, 4  ;;  %s16_s10 = int_to_ptr.vmem [resolvable:$true] %s15_s10  ;;  %s26_s12 = int_to_ptr.vmem [resolvable:$true] %s25_s12 }
   0x3   :  { %s68_s15 = scalar_lea.hbm %s161_s0, 128 }
   0x4   :  { %p69_p0 = scmp.ne.s32.totalorder %s161_s0, %s68_s15  ;;  %p72_p1 = scmp.lt.u32.totalorder %s68_s15, %s161_s0 }
   0x6   :  { %p74_p2 = pnand %p72_p1, %p69_p0 }
   0x8   :  { %77 = shalt.err (!%p74_p2)
}
   0x9   :  { %s78_s20 = scalar_lea.vmem %s16_s10, 128  ;;  %p83_p4 = scmp.lt.s32.totalorder %s16_s10, %s16_s10 }
   0xa   :  { %p79_p3 = scmp.ne.s32.totalorder %s16_s10, %s78_s20  ;;  %p84_p5 = scmp.lt.s32.totalorder %s78_s20, %s78_s20 }
   0xc   :  { %p85_p6 = por %p84_p5, %p83_p4 }
   0xe   :  { %p86_p7 = pnand %p85_p6, %p79_p3 }
  0x10   :  { %89 = shalt.err (!%p86_p7)
}
  0x11   :  { %18 = dma.hbm_to_vmem [thread:$0]  %s161_s0, 128, %s16_s10, [#allocation3]  }
  0x12   :  { %s90_s25 = scalar_lea.hbm %s162_s1, 128 }
  0x13   :  { %p91_p8 = scmp.ne.s32.totalorder %s162_s1, %s90_s25  ;;  %p94_p9 = scmp.lt.u32.totalorder %s90_s25, %s162_s1 }
  0x15   :  { %p96_p10 = pnand %p94_p9, %p91_p8 }
  0x17   :  { %99 = shalt.err (!%p96_p10)
}
  0x18   :  { %s100_s30 = scalar_lea.vmem %s26_s12, 128  ;;  %p105_p12 = scmp.lt.s32.totalorder %s26_s12, %s26_s12 }
  0x19   :  { %p101_p11 = scmp.ne.s32.totalorder %s26_s12, %s100_s30  ;;  %p106_p13 = scmp.lt.s32.totalorder %s100_s30, %s100_s30 }
  0x1b   :  { %p107_p0 = por %p106_p13, %p105_p12 }
  0x1d   :  { %p108_p1 = pnand %p107_p0, %p101_p11 }
  0x1f   :  { %111 = shalt.err (!%p108_p1)
}
  0x20   :  { %28 = dma.hbm_to_vmem [thread:$0]  %s162_s1, 128, %s26_s12, [#allocation5]  }
  0x21   :  { %112 = dma.done.wait [#allocation3], 128  }
  0x22   :  { %113 = vsyncadd [#allocation3], 4294967168 }
  0x23   :  { %114 = dma.done.wait [#allocation5], 128  }
  0x24   :  { %115 = vsyncadd [#allocation5], 4294967168  ;;  %vm40_vm0 = vcmask 130048   ;;  %v35_v0 = vld [vmem:[#allocation2] sm:$0xff]  ;;  %v37_v2 = vlaneseq  ;;  %v36_v5 = vld [vmem:[#allocation4] sm:$0xff]  ;;  %s118_s1 = smov 125  }
  0x25   :  { %v41_v1 = vsel %vm40_vm0, %v35_v0, -inf  ;;  %vm57_vm4 = vcmask 7168  }
  0x26   :  { %42 = vmax.xlane.f32.xlu0 %v41_v1  ;;  %v38_v3 = vand.u32 127, %v37_v2 }
  0x28   :  { %vm39_vm1 = vcmp.ne.s32.totalorder %v38_v3, 3 }
  0xb3   :  { %v43_v4 = vpop.xlane.xlu0 %42 }
  0xb4   :  { %vm44_vm2 = vcmp.eq.f32.partialorder %v35_v0, %v43_v4 }
  0xb5   :  { %vm47_vm3 = vmand %vm44_vm2, %vm39_vm1 }
  0xb6   :  { %v48_v6 = vsel %vm47_vm3, %v36_v5, -inf }
  0xb7   :  { %v49_v7 = vsel %vm40_vm0, %v48_v6, -inf }
  0xb8   :  { %50 = vmax.xlane.f32.xlu0 %v49_v7 }
 0x145   :  { %v51_v8 = vpop.xlane.xlu0 %50 }
 0x146   :  { %v52_v9 = vsub.f32 %v51_v8, %v36_v5 }
 0x148   :  { %54 = vrot.lane.b32.xlu1 %v52_v9, %s118_s1 }
 0x1ba   :  { %v55_v10 = vpop.permute.xlu1 %54 }
 0x1bb   :  { %58 = vst.msk [vmem:[%s163_s2] sm:$0xff] %vm57_vm4, %v55_v10 }
 0x1bc   :  { %63 = vsyncpa [#allocation3], 1 }
 0x1bd   :  { %64 = vsyncpa [#allocation5], 1 }

</bundles_post_ra>
